<compile_context>
chip_gen: v7x
topology: tpu7x:2x2x1
jax: 0.10.0
libtpu: 0.0.40
codegen_flags: <defaults>
</compile_context>

<pallas_src>
import functools

import jax
import jax.numpy as jnp
from jax.experimental import pallas as pl
from jax.experimental.pallas import tpu as pltpu


_VMEM_LIMIT = 32 * 1024 * 1024        # safe on v5e (128 MiB), v6e (128 MiB), v7x (64 MiB)
_COMPUTE_DTYPE = jnp.bfloat16


# --------------------------------------------------------------------------------------
# Tile helpers
# --------------------------------------------------------------------------------------
def _pick_tile(dim, max_tile, quantum):
    """Largest tile <= max_tile that is a multiple of `quantum` and divides `dim`,
    else the full dim (full-dim blocks are always legal)."""
    if dim <= max_tile:
        return dim
    t = (max_tile // quantum) * quantum
    while t >= quantum:
        if dim % t == 0:
            return t
        t -= quantum
    return dim


def _pick_divisor(n, cap):
    cap = max(1, min(n, cap))
    for d in range(cap, 0, -1):
        if n % d == 0:
            return d
    return 1


# --------------------------------------------------------------------------------------
# Pallas kernel: tiled matmul with fused per-column affine (scale, shift) + optional ReLU
# (used for conv1 via im2col and for the three classifier Linear layers)
# --------------------------------------------------------------------------------------
def _matmul_affine_kernel(x_ref, w_ref, scale_ref, shift_ref, o_ref, acc_ref, *, relu):
    k = pl.program_id(2)

    @pl.when(k == 0)
    def _():
        acc_ref[...] = jnp.zeros_like(acc_ref)

    acc_ref[...] += jnp.dot(x_ref[...], w_ref[...], preferred_element_type=jnp.float32)

    @pl.when(k == pl.num_programs(2) - 1)
    def _():
        y = acc_ref[...] * scale_ref[...] + shift_ref[...]
        if relu:
            y = jnp.maximum(y, 0.0)
        o_ref[...] = y.astype(o_ref.dtype)


def matmul_affine(x, w, scale, shift, relu, out_dtype=None):
    """y = relu_opt((x @ w) * scale + shift). x:(M,K) bf16, w:(K,N) bf16, scale/shift f32."""
    M, K = x.shape
    K2, N = w.shape
    assert K == K2
    out_dtype = out_dtype if out_dtype is not None else x.dtype
    tm = _pick_tile(M, 256, 8)
    tk = _pick_tile(K, 2048, 256)     # 256-aligned K tiles (MXU native 256x256 on v6e/v7x)
    tn = _pick_tile(N, 512, 128)
    grid = (M // tm, N // tn, K // tk)
    kernel = functools.partial(_matmul_affine_kernel, relu=relu)
    return pl.pallas_call(
        kernel,
        out_shape=jax.ShapeDtypeStruct((M, N), out_dtype),
        grid_spec=pltpu.PrefetchScalarGridSpec(
            num_scalar_prefetch=0,
            grid=grid,
            in_specs=[
                pl.BlockSpec((tm, tk), lambda i, j, k: (i, k)),
                pl.BlockSpec((tk, tn), lambda i, j, k: (k, j)),
                pl.BlockSpec((1, tn), lambda i, j, k: (0, j)),
                pl.BlockSpec((1, tn), lambda i, j, k: (0, j)),
            ],
            out_specs=pl.BlockSpec((tm, tn), lambda i, j, k: (i, j)),
            scratch_shapes=[pltpu.VMEM((tm, tn), jnp.float32)],
        ),
        compiler_params=pltpu.CompilerParams(
            dimension_semantics=("parallel", "parallel", "arbitrary"),
            vmem_limit_bytes=_VMEM_LIMIT,
        ),
    )(x, w,
      scale.reshape(1, N).astype(jnp.float32),
      shift.reshape(1, N).astype(jnp.float32))


# --------------------------------------------------------------------------------------
# Pallas kernel: fused 3x3 conv (pad=1) + BN affine + ReLU, one padded image per step.
# The padded NHWC image is flattened to ((H+3)*(W+2), Cin); the patch for tap (dy,dx)
# is the contiguous row window starting at dy*(W+2)+dx, so no im2col is materialized.
# The two right-most output columns per row are junk and get sliced off in glue.
# --------------------------------------------------------------------------------------
def _conv3x3_fused_kernel(x_ref, w_ref, scale_ref, shift_ref, o_ref, *, H, Wp):
    M = H * Wp
    cout = o_ref.shape[-1]
    acc = jnp.zeros((M, cout), jnp.float32)
    for dy in range(3):
        for dx in range(3):
            off = dy * Wp + dx
            patch = x_ref[0, pl.ds(off, M), :]                     # (M, Cin) bf16
            acc = acc + jnp.dot(patch, w_ref[dy * 3 + dx],
                                preferred_element_type=jnp.float32)
    y = acc * scale_ref[...] + shift_ref[...]
    o_ref[0] = jnp.maximum(y, 0.0).astype(o_ref.dtype)


def conv3x3_bn_relu_fused(x, wm, scale, shift):
    # x: (N,H,W,Cin) bf16.  wm: (9,Cin,Cout) bf16 (pre-transposed).  scale/shift: (Cout,) f32.
    N, H, W, Cin = x.shape
    Cout = wm.shape[-1]
    Wp = W + 2
    xp = jnp.pad(x, ((0, 0), (1, 2), (1, 1), (0, 0)))              # (N, H+3, W+2, Cin)
    x2 = xp.reshape(N, (H + 3) * Wp, Cin)
    M = H * Wp
    out = pl.pallas_call(
        functools.partial(_conv3x3_fused_kernel, H=H, Wp=Wp),
        out_shape=jax.ShapeDtypeStruct((N, M, Cout), x.dtype),
        grid_spec=pltpu.PrefetchScalarGridSpec(
            num_scalar_prefetch=0,
            grid=(N,),
            in_specs=[
                pl.BlockSpec((1, (H + 3) * Wp, Cin), lambda n: (n, 0, 0)),
                pl.BlockSpec((9, Cin, Cout), lambda n: (0, 0, 0)),   # stays resident
                pl.BlockSpec((1, Cout), lambda n: (0, 0)),
                pl.BlockSpec((1, Cout), lambda n: (0, 0)),
            ],
            out_specs=pl.BlockSpec((1, M, Cout), lambda n: (n, 0, 0)),
        ),
        compiler_params=pltpu.CompilerParams(
            dimension_semantics=("parallel",),
            vmem_limit_bytes=_VMEM_LIMIT,
        ),
    )(x2, wm,
      scale.reshape(1, Cout).astype(jnp.float32),
      shift.reshape(1, Cout).astype(jnp.float32))
    return out.reshape(N, H, Wp, Cout)[:, :, :W, :]


# --------------------------------------------------------------------------------------
# conv1 path (Cin=3): tiny im2col (K=27) + the tiled matmul kernel
# --------------------------------------------------------------------------------------
def _im2col_3x3(x):
    # patch layout index = (dy*3+dx)*C + ci, matching the (2,3,1,0) weight transpose
    N, H, W, C = x.shape
    xp = jnp.pad(x, ((0, 0), (1, 1), (1, 1), (0, 0)))
    patches = [xp[:, dy:dy + H, dx:dx + W, :] for dy in range(3) for dx in range(3)]
    return jnp.concatenate(patches, axis=-1).reshape(N * H * W, 9 * C)


def conv3x3_bn_relu_im2col(x, wm, scale, shift):
    # wm: (9*Cin, Cout) bf16 (pre-transposed)
    N, H, W, Cin = x.shape
    Cout = wm.shape[-1]
    cols = _im2col_3x3(x)
    y = matmul_affine(cols, wm, scale, shift, relu=True)
    return y.reshape(N, H, W, Cout)


# --------------------------------------------------------------------------------------
# Pallas kernel: 2x2 max pool (stride 2) on NHWC, many output rows per grid step
# --------------------------------------------------------------------------------------
def _maxpool_kernel(x_ref, o_ref):
    x = x_ref[...]                   # (Rb, 2, Wo, 2, C)
    m = jnp.max(x, axis=3)           # (Rb, 2, Wo, C)
    o_ref[...] = jnp.max(m, axis=1)  # (Rb, Wo, C)


def maxpool2x2(x, target_block_bytes=512 * 1024):
    # x: (N, H, W, C) NHWC, H and W even
    N, H, W, C = x.shape
    assert H % 2 == 0 and W % 2 == 0
    Ho, Wo = H // 2, W // 2
    R = N * Ho
    xr = x.reshape(R, 2, Wo, 2, C)   # glue reshape only; reduction is in-kernel
    bytes_per_row = 2 * Wo * 2 * C * x.dtype.itemsize
    Rb = _pick_divisor(R, max(1, target_block_bytes // bytes_per_row))
    out = pl.pallas_call(
        _maxpool_kernel,
        out_shape=jax.ShapeDtypeStruct((R, Wo, C), x.dtype),
        grid_spec=pltpu.PrefetchScalarGridSpec(
            num_scalar_prefetch=0,
            grid=(R // Rb,),
            in_specs=[pl.BlockSpec((Rb, 2, Wo, 2, C), lambda i: (i, 0, 0, 0, 0))],
            out_specs=pl.BlockSpec((Rb, Wo, C), lambda i: (i, 0, 0)),
        ),
        compiler_params=pltpu.CompilerParams(
            dimension_semantics=("parallel",),
            vmem_limit_bytes=_VMEM_LIMIT,
        ),
    )(xr)
    return out.reshape(N, Ho, Wo, C)


# --------------------------------------------------------------------------------------
# JAX glue: adaptive average pool (exact PyTorch bin formula, with fast paths)
# --------------------------------------------------------------------------------------
def adaptive_avg_pool_nhwc(x, out_hw):
    N, H, W, C = x.shape
    OH, OW = out_hw
    if (H, W) == (OH, OW):
        return x                                        # standard 224 input: identity
    if H == 1 and W == 1:
        return jnp.broadcast_to(x, (N, OH, OW, C))      # tiny inputs: broadcast
    rows = []
    for i in range(OH):
        h0 = (i * H) // OH
        h1 = -(-((i + 1) * H) // OH)
        cols = []
        for j in range(OW):
            w0 = (j * W) // OW
            w1 = -(-((j + 1) * W) // OW)
            cols.append(jnp.mean(x[:, h0:h1, w0:w1, :], axis=(1, 2)))
        rows.append(jnp.stack(cols, axis=1))
    return jnp.stack(rows, axis=1)


# --------------------------------------------------------------------------------------
# Layers
# --------------------------------------------------------------------------------------
def linear(x, wt, b, relu, out_dtype=None):
    # wt: (in_features, out_features) bf16, pre-transposed at prepare time
    ones = jnp.ones((wt.shape[1],), jnp.float32)
    return matmul_affine(x, wt, ones, b, relu=relu, out_dtype=out_dtype)


# --------------------------------------------------------------------------------------
# VGG11_BN parameters (deterministic synthetic init, torch layout) + one-time prep
# --------------------------------------------------------------------------------------
_VGG11_CFG = [64, "M", 128, "M", 256, 256, "M", 512, 512, "M", 512, 512, "M"]


def init_params(key):
    params = {"features": [], "classifier": []}
    cin = 3
    for v in _VGG11_CFG:
        if v == "M":
            params["features"].append(("M",))
            continue
        key, k1, k2, k3, k4, k5, k6 = jax.random.split(key, 7)
        fan_in = cin * 9
        w = jax.random.normal(k1, (v, cin, 3, 3), jnp.float32) * (2.0 / fan_in) ** 0.5
        b = 0.01 * jax.random.normal(k2, (v,), jnp.float32)
        gamma = 1.0 + 0.1 * jax.random.normal(k3, (v,), jnp.float32)
        beta = 0.1 * jax.random.normal(k4, (v,), jnp.float32)
        rmean = 0.1 * jax.random.normal(k5, (v,), jnp.float32)
        rvar = 1.0 + 0.1 * jax.random.uniform(k6, (v,), jnp.float32)
        params["features"].append(("C", w, b, gamma, beta, rmean, rvar))
        cin = v
    for din, dout in [(512 * 7 * 7, 4096), (4096, 4096), (4096, 1000)]:
        key, k1, k2 = jax.random.split(key, 3)
        w = jax.random.normal(k1, (dout, din), jnp.float32) * (1.0 / din) ** 0.5
        b = 0.01 * jax.random.normal(k2, (dout,), jnp.float32)
        params["classifier"].append((w, b))
    return params


def prepare_params(raw, eps=1e-5, dtype=_COMPUTE_DTYPE):
    """One-time (outside forward): fold BN, transpose/reshape weights, cast to bf16."""
    prepared = {"features": [], "classifier": []}
    for layer in raw["features"]:
        if layer[0] == "M":
            prepared["features"].append(("M",))
            continue
        _, w, b, gamma, beta, rmean, rvar = layer
        cout, cin = w.shape[0], w.shape[1]
        scale = (gamma / jnp.sqrt(rvar + eps)).astype(jnp.float32)
        shift = ((b - rmean) * scale + beta).astype(jnp.float32)
        wt = jnp.transpose(w, (2, 3, 1, 0)).astype(dtype)            # (3,3,Cin,Cout)
        if cin < 8:                                                  # conv1: im2col path
            prepared["features"].append(("C_IM2COL", wt.reshape(9 * cin, cout), scale, shift))
        else:                                                        # fused-tap path
            prepared["features"].append(("C_FUSED", wt.reshape(9, cin, cout), scale, shift))
    for (w, b) in raw["classifier"]:
        prepared["classifier"].append((jnp.transpose(w).astype(dtype),
                                       b.astype(jnp.float32)))
    return prepared


def vgg11_bn_forward(params, x_nchw):
    # x_nchw: (N, 3, H, W) float32, H and W multiples of 32
    x = jnp.transpose(x_nchw, (0, 2, 3, 1)).astype(_COMPUTE_DTYPE)   # -> NHWC bf16
    for layer in params["features"]:
        kind = layer[0]
        if kind == "M":
            x = maxpool2x2(x)
        elif kind == "C_IM2COL":
            _, wm, scale, shift = layer
            x = conv3x3_bn_relu_im2col(x, wm, scale, shift)
        else:
            _, wm, scale, shift = layer
            x = conv3x3_bn_relu_fused(x, wm, scale, shift)
    x = adaptive_avg_pool_nhwc(x, (7, 7))                            # (N,7,7,512)
    x = jnp.transpose(x, (0, 3, 1, 2)).reshape(x.shape[0], -1)       # torch.flatten order
    (w1, b1), (w2, b2), (w3, b3) = params["classifier"]
    x = linear(x, w1, b1, relu=True)     # Dropout -> identity (inference)
    x = linear(x, w2, b2, relu=True)     # Dropout -> identity (inference)
    logits = linear(x, w3, b3, relu=False, out_dtype=jnp.float32)
    return logits                         # (N, 1000) float32


if __name__ == "__main__":
    key = jax.random.PRNGKey(0)
    kp, kx = jax.random.split(key)
    raw = init_params(kp)
    params = prepare_params(raw)          # hoisted weight transforms (done once)
    del raw
    x = jax.random.normal(kx, (2, 3, 32, 32), jnp.float32)   # NCHW input
    logits = vgg11_bn_forward(params, x)
    logits = jax.block_until_ready(logits)
    assert logits.shape == (2, 1000), logits.shape
    assert bool(jnp.all(jnp.isfinite(logits)))
    print("KERNEL_OK")
</pallas_src>

<mosaic_0001>
module attributes {stable_mosaic.version = 11 : i64} {
  func.func @_matmul_affine_kernel(%arg0: i32, %arg1: i32, %arg2: i32, %arg3: memref<256x27xbf16, #tpu.memory_space<vmem>>, %arg4: memref<27x64xbf16, #tpu.memory_space<vmem>>, %arg5: memref<1x64xf32, #tpu.memory_space<vmem>>, %arg6: memref<1x64xf32, #tpu.memory_space<vmem>>, %arg7: memref<256x64xbf16, #tpu.memory_space<vmem>>, %arg8: memref<256x64xf32, #tpu.memory_space<vmem>>) attributes {dimension_semantics = [#tpu.dimension_semantics<parallel>, #tpu.dimension_semantics<parallel>, #tpu.dimension_semantics<arbitrary>], iteration_bounds = array<i64: 8, 1, 1>, scalar_prefetch = 0 : i64, scratch_operands = 1 : i64, tpu.core_type = #tpu.core_type<tc>, window_params = [{transform_indices = @transform_0, window_bounds = array<i64: 256, 27>}, {transform_indices = @transform_1, window_bounds = array<i64: 27, 64>}, {transform_indices = @transform_2, window_bounds = array<i64: 1, 64>}, {transform_indices = @transform_3, window_bounds = array<i64: 1, 64>}, {transform_indices = @transform_4, window_bounds = array<i64: 256, 64>}]} {
    %c0_i32 = arith.constant 0 : i32
    %0 = arith.cmpi eq, %arg2, %c0_i32 : i32
    %1 = arith.extui %0 : i1 to i32
    %c0_i32_0 = arith.constant 0 : i32
    %2 = arith.cmpi ne, %1, %c0_i32_0 : i32
    scf.if %2 {
      %cst_10 = arith.constant 0.000000e+00 : f32
      %12 = vector.broadcast %cst_10 : f32 to vector<256x64xf32>
      %c0_11 = arith.constant 0 : index
      %c0_12 = arith.constant 0 : index
      %13 = vector.load %arg8[%c0_11, %c0_12] : memref<256x64xf32, #tpu.memory_space<vmem>>, vector<256x64xf32>
      tpu.vector_store %arg8[%c0_11, %c0_12], %12 {strides = array<i32>} : memref<256x64xf32, #tpu.memory_space<vmem>>, vector<256x64xf32>,
    } else {
    }
    %c0 = arith.constant 0 : index
    %c0_1 = arith.constant 0 : index
    %3 = vector.load %arg8[%c0, %c0_1] : memref<256x64xf32, #tpu.memory_space<vmem>>, vector<256x64xf32>
    %c0_2 = arith.constant 0 : index
    %c0_3 = arith.constant 0 : index
    %4 = vector.load %arg3[%c0_2, %c0_3] : memref<256x27xbf16, #tpu.memory_space<vmem>>, vector<256x27xbf16>
    %c0_4 = arith.constant 0 : index
    %c0_5 = arith.constant 0 : index
    %5 = vector.load %arg4[%c0_4, %c0_5] : memref<27x64xbf16, #tpu.memory_space<vmem>>, vector<27x64xbf16>
    %cst = arith.constant dense<0.000000e+00> : vector<256x64xf32>
    %6 = tpu.matmul %4, %5, %cst {dimension_numbers = #tpu.dot_dimension_numbers<[1], [0], [0], [1], [0, 0, 1, 1], [], []>} : vector<256x27xbf16>, vector<27x64xbf16>, vector<256x64xf32> -> vector<256x64xf32>
    %7 = arith.addf %3, %6 : vector<256x64xf32>
    %c0_6 = arith.constant 0 : index
    %c0_7 = arith.constant 0 : index
    %8 = vector.load %arg8[%c0_6, %c0_7] : memref<256x64xf32, #tpu.memory_space<vmem>>, vector<256x64xf32>
    tpu.vector_store %arg8[%c0_6, %c0_7], %7 {strides = array<i32>} : memref<256x64xf32, #tpu.memory_space<vmem>>, vector<256x64xf32>,
    %c0_i32_8 = arith.constant 0 : i32
    %9 = arith.cmpi eq, %arg2, %c0_i32_8 : i32
    %10 = arith.extui %9 : i1 to i32
    %c0_i32_9 = arith.constant 0 : i32
    %11 = arith.cmpi ne, %10, %c0_i32_9 : i32
    scf.if %11 {
      %c0_10 = arith.constant 0 : index
      %c0_11 = arith.constant 0 : index
      %12 = vector.load %arg8[%c0_10, %c0_11] : memref<256x64xf32, #tpu.memory_space<vmem>>, vector<256x64xf32>
      %c0_12 = arith.constant 0 : index
      %c0_13 = arith.constant 0 : index
      %13 = vector.load %arg5[%c0_12, %c0_13] : memref<1x64xf32, #tpu.memory_space<vmem>>, vector<1x64xf32>
      %14 = vector.broadcast %13 : vector<1x64xf32> to vector<256x64xf32>
      %15 = arith.mulf %12, %14 : vector<256x64xf32>
      %c0_14 = arith.constant 0 : index
      %c0_15 = arith.constant 0 : index
      %16 = vector.load %arg6[%c0_14, %c0_15] : memref<1x64xf32, #tpu.memory_space<vmem>>, vector<1x64xf32>
      %17 = vector.broadcast %16 : vector<1x64xf32> to vector<256x64xf32>
      %18 = arith.addf %15, %17 : vector<256x64xf32>
      %cst_16 = arith.constant 0.000000e+00 : f32
      %19 = vector.broadcast %cst_16 : f32 to vector<256x64xf32>
      %20 = arith.maximumf %18, %19 : vector<256x64xf32>
      %21 = arith.truncf %20 : vector<256x64xf32> to vector<256x64xbf16>
      %c0_17 = arith.constant 0 : index
      %c0_18 = arith.constant 0 : index
      %22 = vector.load %arg7[%c0_17, %c0_18] : memref<256x64xbf16, #tpu.memory_space<vmem>>, vector<256x64xbf16>
      tpu.vector_store %arg7[%c0_17, %c0_18], %21 {strides = array<i32>} : memref<256x64xbf16, #tpu.memory_space<vmem>>, vector<256x64xbf16>,
    } else {
    }
    return
  }
  func.func @transform_0(%arg0: i32, %arg1: i32, %arg2: i32) -> (i32, i32) {
    %c0_i32 = arith.constant 0 : i32
    return %arg0, %arg2 : i32, i32
  }
  func.func @transform_1(%arg0: i32, %arg1: i32, %arg2: i32) -> (i32, i32) {
    %c0_i32 = arith.constant 0 : i32
    return %arg2, %arg1 : i32, i32
  }
  func.func @transform_2(%arg0: i32, %arg1: i32, %arg2: i32) -> (i32, i32) {
    %c0_i32 = arith.constant 0 : i32
    %c0_i32_0 = arith.constant 0 : i32
    return %c0_i32, %arg1 : i32, i32
  }
  func.func @transform_3(%arg0: i32, %arg1: i32, %arg2: i32) -> (i32, i32) {
    %c0_i32 = arith.constant 0 : i32
    %c0_i32_0 = arith.constant 0 : i32
    return %c0_i32, %arg1 : i32, i32
  }
  func.func @transform_4(%arg0: i32, %arg1: i32, %arg2: i32) -> (i32, i32) {
    %c0_i32 = arith.constant 0 : i32
    return %arg0, %arg1 : i32, i32
  }
}

</mosaic_0001>

<bundles_post_ra>
// kernel: tpu_custom_call.1
= control target key start
LH: loop header
LB: loop body
LE: loop exit
PB: predicated region body
PF: predicated region fallthrough
CT: control target
= control target key end

     0   :  { %s1475_s15 = smov 0   ;;  %s1477_s16 = smov 0   ;;  %s1796_s0 = inlined_call_operand.vmem [shape: bf16[2048,27], index: 0, kind: input, shape index: {}]   ;;  %s1797_s1 = inlined_call_operand.vmem [shape: bf16[27,64], index: 1, kind: input, shape index: {}]   ;;  %s1798_s2 = inlined_call_operand.vmem [shape: f32[1,64], index: 2, kind: input, shape index: {}]   ;;  %s1799_s3 = inlined_call_operand.vmem [shape: f32[1,64], index: 3, kind: input, shape index: {}]   ;;  %s1800_s4 = inlined_call_operand.vmem [shape: bf16[2048,64], index: 4, kind: output, shape index: {}]  }
   0x1   :  { %s1479_s17 = smov 0  }
   0x2 LB: > { %s33_s18 = sadd.s32 1, %s1442_s16  ;;  %p1215_p0 = scmp.ge.s32.totalorder %s1446_s17, 1  ;;  %s1446_s17 = sphi %s1479_s17, %s14_s17   ;;  %s1442_s16 = sphi %s1477_s16, %s1803_s16   ;;  %s1438_s15 = sphi %s1475_s15, %s1802_s15  }
   0x3   : > { %p35_p1 = scmp.ge.s32.totalorder %s33_s18, 8  ;;  %p221_p2 = scmp.lt.s32.totalorder %s1446_s17, 9 }
   0x5   : > { %s1805_s18 = smov (%p35_p1, %s33_s18), 0  ;;  %p222_p3 = pnand %p1215_p0, %p221_p2 }
   0x6   : > { %v1406_v0 = vld [vmem:[%s1797_s1] sm:$0xff] (!%p222_p3)   ;;  %vm546_vm0 = vcmask (!%p222_p3), 1044480   ;;  %v1407_v1 = vld [vmem:[%s1797_s1 + $0x8] sm:$0x3f] (!%p222_p3)   ;;  %vm547_vm1 = vcmask (!%p222_p3), 1045504   ;;  %s1216_s23 = sshll.u32 (!%p222_p3), %s1438_s15, 5 }
   0x7   : > { %225 = sbr.rel (%p222_p3) target bundleno = 291 (0x123), region = 36  ;;  %1340 = vmatprep.subr.bf16.mxu0 (!%p222_p3), %v1406_v0  ;;  %1376 = vmatprep.subr.bf16.mxu1 (!%p222_p3), %v1406_v0  ;;  %vm305_vm2 = vcmask (!%p222_p3), 523264   ;;  %v1448_v2 = vmov (!%p222_p3), 65535   ;;  %p1504_p4 = scmp.lt.s32.totalorder (!%p222_p3), %s1216_s23, 255  ;;  %v1449_v5 = vmov (!%p222_p3), 0.0   ;;  %vm497_vm3 = vcmask (!%p222_p3), 220160  }
   0x8   : > { %1341 = vmatpush3.bf16.msra.mxu0 (!%p222_p3), %v1406_v0  ;;  %1378 = vmatpush3.bf16.msra.mxu1 (!%p222_p3), %v1406_v0  ;;  %v548_v3 = vsel (!%p222_p3), %vm546_vm0, 4294967295, %v1448_v2  ;;  %308 = vst.msk [vmem:[#allocation2 + $0x10] sm:$0xff] (!%p222_p3), %vm305_vm2, %v1449_v5  ;;  %306 = vst.msk [vmem:[#allocation2] sm:$0xff] (!%p222_p3), %vm305_vm2, %v1449_v5  ;;  %v1597_v50 = vld [vmem:[%s1798_s2] ss:$0 sm:$0xff] (!%p222_p3)  ;;  %vm1052_vm4 = vcmask (!%p222_p3), 519168  }
   0x9   : > { %v549_v4 = vsel (!%p222_p3), %vm547_vm1, %v548_v3, 0  ;;  %307 = vst.msk [vmem:[#allocation2 + $0x8] sm:$0xff] (!%p222_p3), %vm305_vm2, %v1449_v5  ;;  %309 = vst.msk [vmem:[#allocation2 + $0x18] sm:$0xff] (!%p222_p3), %vm305_vm2, %v1449_v5  ;;  %v1602_v60 = vld [vmem:[%s1799_s3] ss:$0 sm:$0xff] (!%p222_p3) }
   0xa   : > { %310 = vst.msk [vmem:[#allocation2 + $0x20] sm:$0xff] (!%p222_p3), %vm305_vm2, %v1449_v5  ;;  %311 = vst.msk [vmem:[#allocation2 + $0x28] sm:$0xff] (!%p222_p3), %vm305_vm2, %v1449_v5  ;;  %v551_v6 = vand.u32 (!%p222_p3), %v1407_v1, %v549_v4 }
   0xb   : > { %312 = vst.msk [vmem:[#allocation2 + $0x30] sm:$0xff] (!%p222_p3), %vm305_vm2, %v1449_v5  ;;  %313 = vst.msk [vmem:[#allocation2 + $0x38] sm:$0xff] (!%p222_p3), %vm305_vm2, %v1449_v5 }
   0xc   : > { %314 = vst.msk [vmem:[#allocation2 + $0x40] sm:$0xff] (!%p222_p3), %vm305_vm2, %v1449_v5  ;;  %315 = vst.msk [vmem:[#allocation2 + $0x48] sm:$0xff] (!%p222_p3), %vm305_vm2, %v1449_v5  ;;  %1342 = vmatprep.subr.bf16.mxu0 (!%p222_p3), %v551_v6  ;;  %1377 = vmatprep.subr.bf16.mxu1 (!%p222_p3), %v551_v6 }
   0xd   : > { %316 = vst.msk [vmem:[#allocation2 + $0x50] sm:$0xff] (!%p222_p3), %vm305_vm2, %v1449_v5  ;;  %317 = vst.msk [vmem:[#allocation2 + $0x58] sm:$0xff] (!%p222_p3), %vm305_vm2, %v1449_v5  ;;  %1343 = vmatpush3.bf16.msra.mxu0 (!%p222_p3), %v551_v6  ;;  %1379 = vmatpush3.bf16.msra.mxu1 (!%p222_p3), %v551_v6 }
   0xe   : > { %318 = vst.msk [vmem:[#allocation2 + $0x60] sm:$0xff] %vm305_vm2, %v1449_v5  ;;  %319 = vst.msk [vmem:[#allocation2 + $0x68] sm:$0xff] %vm305_vm2, %v1449_v5  ;;  %s1807_s23 = smov (!%p1504_p4, %s1216_s23), 255 }
   0xf   : > { %320 = vst.msk [vmem:[#allocation2 + $0x70] sm:$0xff] %vm305_vm2, %v1449_v5  ;;  %321 = vst.msk [vmem:[#allocation2 + $0x78] sm:$0xff] %vm305_vm2, %v1449_v5  ;;  %s1217_s25 = sshll.u32 %s1807_s23, 2  ;;  %v340_v23 = vld [vmem:[#allocation2 + $0x10] sm:$0xff]  ;;  %v338_v25 = vld [vmem:[#allocation2] sm:$0xff] }
  0x10   : > { %322 = vst.msk [vmem:[#allocation2 + $0x80] sm:$0xff] %vm305_vm2, %v1449_v5  ;;  %323 = vst.msk [vmem:[#allocation2 + $0x88] sm:$0xff] %vm305_vm2, %v1449_v5  ;;  %s1552_s28 = scalar_lea.vmem %s1796_s0, %s1217_s25  ;;  %v341_v28 = vld [vmem:[#allocation2 + $0x18] sm:$0xff]  ;;  %v339_v33 = vld [vmem:[#allocation2 + $0x8] sm:$0xff]  ;;  %s1630_s9 = scalar_lea.vmem %s1800_s4, %s1217_s25 }
  0x11   : > { %324 = vst.msk [vmem:[#allocation2 + $0x90] sm:$0xff] %vm305_vm2, %v1449_v5  ;;  %325 = vst.msk [vmem:[#allocation2 + $0x98] sm:$0xff] %vm305_vm2, %v1449_v5  ;;  %v1408_v7 = vld [vmem:[%s1552_s28] sm:$0xff]   ;;  %v1410_v9 = vld [vmem:[%s1552_s28 + $0x8] sm:$0xff]  }
  0x12   : > { %326 = vst.msk [vmem:[#allocation2 + $0xa0] sm:$0xff] %vm305_vm2, %v1449_v5  ;;  %327 = vst.msk [vmem:[#allocation2 + $0xa8] sm:$0xff] %vm305_vm2, %v1449_v5  ;;  %v1409_v8 = vld [vmem:[%s1552_s28 + $0x40] sm:$0xff]   ;;  %1344 = vmatprep.mubr.msk.bf16.mxu0 %vm497_vm3, %v1408_v7  ;;  %v1411_v10 = vld [vmem:[%s1552_s28 + $0x48] sm:$0xff]  }
  0x13   : > { %328 = vst.msk [vmem:[#allocation2 + $0xb0] sm:$0xff] %vm305_vm2, %v1449_v5  ;;  %329 = vst.msk [vmem:[#allocation2 + $0xb8] sm:$0xff] %vm305_vm2, %v1449_v5  ;;  %1360 = vmatprep.mubr.msk.bf16.mxu1 %vm497_vm3, %v1409_v8  ;;  %1345 = vmatmul.mubr.msk.bf16.vlgmr.msra.gmra.mrb[0].mxu0 %vm497_vm3, %v1410_v9  ;;  %v1412_v11 = vld [vmem:[%s1552_s28 + $0x10] sm:$0xff]   ;;  %v1414_v13 = vld [vmem:[%s1552_s28 + $0x18] sm:$0xff]  }
  0x14   : > { %330 = vst.msk [vmem:[#allocation2 + $0xc0] sm:$0xff] %vm305_vm2, %v1449_v5  ;;  %331 = vst.msk [vmem:[#allocation2 + $0xc8] sm:$0xff] %vm305_vm2, %v1449_v5  ;;  %1361 = vmatmul.mubr.msk.bf16.vlgmr.msra.gmra.mrb[0].mxu1 %vm497_vm3, %v1411_v10  ;;  %v1413_v12 = vld [vmem:[%s1552_s28 + $0x50] sm:$0xff]   ;;  %1348 = vmatprep.mubr.msk.bf16.mxu0 %vm497_vm3, %v1412_v11  ;;  %v1415_v14 = vld [vmem:[%s1552_s28 + $0x58] sm:$0xff]  }
  0x15   : > { %332 = vst.msk [vmem:[#allocation2 + $0xd0] sm:$0xff] %vm305_vm2, %v1449_v5  ;;  %333 = vst.msk [vmem:[#allocation2 + $0xd8] sm:$0xff] %vm305_vm2, %v1449_v5  ;;  %1364 = vmatprep.mubr.msk.bf16.mxu1 %vm497_vm3, %v1413_v12  ;;  %v1416_v15 = vld [vmem:[%s1552_s28 + $0x20] sm:$0xff]   ;;  %v1418_v17 = vld [vmem:[%s1552_s28 + $0x28] sm:$0xff]  }
  0x16   : > { %334 = vst.msk [vmem:[#allocation2 + $0xe0] sm:$0xff] %vm305_vm2, %v1449_v5  ;;  %335 = vst.msk [vmem:[#allocation2 + $0xe8] sm:$0xff] %vm305_vm2, %v1449_v5  ;;  %v1417_v16 = vld [vmem:[%s1552_s28 + $0x60] sm:$0xff]   ;;  %v1419_v18 = vld [vmem:[%s1552_s28 + $0x68] sm:$0xff]  }
  0x17   : > { %336 = vst.msk [vmem:[#allocation2 + $0xf0] sm:$0xff] %vm305_vm2, %v1449_v5  ;;  %337 = vst.msk [vmem:[#allocation2 + $0xf8] sm:$0xff] %vm305_vm2, %v1449_v5  ;;  %v1420_v19 = vld [vmem:[%s1552_s28 + $0x30] sm:$0xff]   ;;  %v1422_v21 = vld [vmem:[%s1552_s28 + $0x38] sm:$0xff]  }
  0x18   : > { %v1421_v20 = vld [vmem:[%s1552_s28 + $0x70] sm:$0xff]   ;;  %v1423_v22 = vld [vmem:[%s1552_s28 + $0x78] sm:$0xff]   ;;  %v354_v27 = vld [vmem:[#allocation2 + $0x80] sm:$0xff] }
  0x19   : > { %v356_v24 = vld [vmem:[#allocation2 + $0x90] sm:$0xff]  ;;  %v357_v32 = vld [vmem:[#allocation2 + $0x98] sm:$0xff]  ;;  %v355_v38 = vld [vmem:[#allocation2 + $0x88] sm:$0xff] }
  0x1a   : > { %v344_v47 = vld [vmem:[#allocation2 + $0x30] sm:$0xff]  ;;  %v342_v49 = vld [vmem:[#allocation2 + $0x20] sm:$0xff]  ;;  %v345_v53 = vld [vmem:[#allocation2 + $0x38] sm:$0xff] }
  0x1b   : > { %1349 = vmatmul.mubr.msk.bf16.gmra.mrb[4].mxu0 %vm497_vm3, %v1414_v13  ;;  %v360_v48 = vld [vmem:[#allocation2 + $0xb0] sm:$0xff]  ;;  %v358_v52 = vld [vmem:[#allocation2 + $0xa0] sm:$0xff]  ;;  %v361_v57 = vld [vmem:[#allocation2 + $0xb8] sm:$0xff] }
  0x1c   : > { %1365 = vmatmul.mubr.msk.bf16.gmra.mrb[4].mxu1 %vm497_vm3, %v1415_v14  ;;  %1352 = vmatprep.mubr.msk.bf16.mxu0 %vm497_vm3, %v1416_v15  ;;  %v343_v58 = vld [vmem:[#allocation2 + $0x28] sm:$0xff] }
  0x1d   : > { %1368 = vmatprep.mubr.msk.bf16.mxu1 %vm497_vm3, %v1417_v16  ;;  %v359_v1 = vld [vmem:[#allocation2 + $0xa8] sm:$0xff] }
  0x23   : > { %1353 = vmatmul.mubr.msk.bf16.gmra.mrb[8].mxu0 %vm497_vm3, %v1418_v17 }
  0x24   : > { %1369 = vmatmul.mubr.msk.bf16.gmra.mrb[8].mxu1 %vm497_vm3, %v1419_v18  ;;  %1356 = vmatprep.mubr.msk.bf16.mxu0 %vm497_vm3, %v1420_v19 }
  0x25   : > { %1372 = vmatprep.mubr.msk.bf16.mxu1 %vm497_vm3, %v1421_v20 }
  0x2b   : > { %1357 = vmatmul.mubr.msk.bf16.gmra.mrb[12].mxu0 %vm497_vm3, %v1422_v21 }
  0x2c   : > { %1373 = vmatmul.mubr.msk.bf16.gmra.mrb[12].mxu1 %vm497_vm3, %v1423_v22 }
  0xe6   : > { %v1346_v26 = vpop.f32.mrb[0].mxu0 }
  0xe7   : > { %v716_v29 = vadd.f32 %v1346_v26, %v340_v23  ;;  %v1362_v30 = vpop.f32.mrb[0].mxu1  ;;  %v587_v31 = vpop.f32.mrb[1].mxu0 }
  0xe8   : > { %v732_v34 = vadd.f32 %v1362_v30, %v356_v24  ;;  %v714_v35 = vadd.f32 %v587_v31, %v338_v25  ;;  %v651_v36 = vpop.f32.mrb[1].mxu1  ;;  %v1347_v37 = vpop.f32.mrb[2].mxu0 }
  0xe9   : > { %749 = vst.msk [vmem:[#allocation2 + $0x10] sm:$0xff] %vm305_vm2, %v716_v29  ;;  %v730_v39 = vadd.f32 %v651_v36, %v354_v27  ;;  %v717_v40 = vadd.f32 %v1347_v37, %v341_v28  ;;  %v1363_v41 = vpop.f32.mrb[2].mxu1  ;;  %v590_v42 = vpop.f32.mrb[3].mxu0 }
  0xea   : > { %765 = vst.msk [vmem:[#allocation2 + $0x90] sm:$0xff] %vm305_vm2, %v732_v34  ;;  %747 = vst.msk [vmem:[#allocation2] sm:$0xff] %vm305_vm2, %v714_v35  ;;  %v733_v43 = vadd.f32 %v1363_v41, %v357_v32  ;;  %v715_v44 = vadd.f32 %v590_v42, %v339_v33  ;;  %v654_v45 = vpop.f32.mrb[3].mxu1 }
  0xeb   : > { %763 = vst.msk [vmem:[#allocation2 + $0x80] sm:$0xff] %vm305_vm2, %v730_v39  ;;  %750 = vst.msk [vmem:[#allocation2 + $0x18] sm:$0xff] %vm305_vm2, %v717_v40  ;;  %v731_v46 = vadd.f32 %v654_v45, %v355_v38 }
  0xec   : > { %766 = vst.msk [vmem:[#allocation2 + $0x98] sm:$0xff] %vm305_vm2, %v733_v43  ;;  %748 = vst.msk [vmem:[#allocation2 + $0x8] sm:$0xff] %vm305_vm2, %v715_v44 }
  0xed   : > { %764 = vst.msk [vmem:[#allocation2 + $0x88] sm:$0xff] %vm305_vm2, %v731_v46 }
  0xee   : > { %v1350_v51 = vpop.f32.mrb[4].mxu0 }
  0xef   : > { %v720_v54 = vadd.f32 %v1350_v51, %v344_v47  ;;  %v1366_v55 = vpop.f32.mrb[4].mxu1  ;;  %v603_v56 = vpop.f32.mrb[5].mxu0 }
  0xf0   : > { %v784_v59 = vld [vmem:[#allocation2 + $0x10] sm:$0xff]  ;;  %v736_v61 = vadd.f32 %v1366_v55, %v360_v48  ;;  %v718_v62 = vadd.f32 %v603_v56, %v342_v49  ;;  %v667_v63 = vpop.f32.mrb[5].mxu1  ;;  %v1351_v0 = vpop.f32.mrb[6].mxu0 }
  0xf1   : > { %v823_v2 = vmul.f32 %v1597_v50, %v784_v59  ;;  %v800_v3 = vld [vmem:[#allocation2 + $0x90] sm:$0xff]  ;;  %v782_v4 = vld [vmem:[#allocation2] sm:$0xff]  ;;  %753 = vst.msk [vmem:[#allocation2 + $0x30] sm:$0xff] %vm305_vm2, %v720_v54  ;;  %v734_v5 = vadd.f32 %v667_v63, %v358_v52  ;;  %v721_v6 = vadd.f32 %v1351_v0, %v345_v53  ;;  %v1367_v7 = vpop.f32.mrb[6].mxu1  ;;  %v606_v8 = vpop.f32.mrb[7].mxu0 }
  0xf2   : > { %v839_v9 = vmul.f32 %v1597_v50, %v800_v3  ;;  %v821_v10 = vmul.f32 %v1597_v50, %v782_v4  ;;  %v798_v11 = vld [vmem:[#allocation2 + $0x80] sm:$0xff]  ;;  %v785_v12 = vld [vmem:[#allocation2 + $0x18] sm:$0xff]  ;;  %769 = vst.msk [vmem:[#allocation2 + $0xb0] sm:$0xff] %vm305_vm2, %v736_v61  ;;  %751 = vst.msk [vmem:[#allocation2 + $0x20] sm:$0xff] %vm305_vm2, %v718_v62  ;;  %v737_v13 = vadd.f32 %v1367_v7, %v361_v57  ;;  %v670_v15 = vpop.f32.mrb[7].mxu1 }
  0xf3   : > { %v719_v14 = vadd.f32 %v606_v8, %v343_v58  ;;  %v862_v16 = vadd.f32 %v1602_v60, %v823_v2  ;;  %v837_v17 = vmul.f32 %v1597_v50, %v798_v11  ;;  %v824_v18 = vmul.f32 %v1597_v50, %v785_v12  ;;  %v801_v19 = vld [vmem:[#allocation2 + $0x98] sm:$0xff]  ;;  %v783_v20 = vld [vmem:[#allocation2 + $0x8] sm:$0xff]  ;;  %767 = vst.msk [vmem:[#allocation2 + $0xa0] sm:$0xff] %vm305_vm2, %v734_v5 }
  0xf4   : > { %754 = vst.msk [vmem:[#allocation2 + $0x38] sm:$0xff] %vm305_vm2, %v721_v6  ;;  %v735_v21 = vadd.f32 %v670_v15, %v359_v1  ;;  %v878_v22 = vadd.f32 %v1602_v60, %v839_v9  ;;  %v860_v23 = vadd.f32 %v1602_v60, %v821_v10  ;;  %v840_v24 = vmul.f32 %v1597_v50, %v801_v19  ;;  %v799_v26 = vld [vmem:[#allocation2 + $0x88] sm:$0xff] }
  0xf5   : > { %v822_v25 = vmul.f32 %v1597_v50, %v783_v20  ;;  %770 = vst.msk [vmem:[#allocation2 + $0xb8] sm:$0xff] %vm305_vm2, %v737_v13  ;;  %752 = vst.msk [vmem:[#allocation2 + $0x28] sm:$0xff] %vm305_vm2, %v719_v14  ;;  %v894_v27 = vmax.f32 %v862_v16, 0.0  ;;  %v876_v28 = vadd.f32 %v1602_v60, %v837_v17  ;;  %v863_v29 = vadd.f32 %v1602_v60, %v824_v18  ;;  %v348_v17 = vld [vmem:[#allocation2 + $0x50] sm:$0xff] }
  0xf6   : > { %v838_v30 = vmul.f32 %v1597_v50, %v799_v26  ;;  %768 = vst.msk [vmem:[#allocation2 + $0xa8] sm:$0xff] %vm305_vm2, %v735_v21  ;;  %v910_v31 = vmax.f32 %v878_v22, 0.0  ;;  %v892_v32 = vmax.f32 %v860_v23, 0.0  ;;  %v879_v33 = vadd.f32 %v1602_v60, %v840_v24  ;;  %v1634_v35 = vpop.f32.mrb[8].mxu0  ;;  %v364_v22 = vld [vmem:[#allocation2 + $0xd0] sm:$0xff]  ;;  %v346_v23 = vld [vmem:[#allocation2 + $0x40] sm:$0xff] }
  0xf7   : > { %v861_v34 = vadd.f32 %v1602_v60, %v822_v25  ;;  %v1292_v36 = vpack.c.bf16 %v894_v27, %v894_v27  ;;  %v908_v37 = vmax.f32 %v876_v28, 0.0  ;;  %v895_v38 = vmax.f32 %v863_v29, 0.0  ;;  %v1637_v40 = vpop.f32.mrb[8].mxu1  ;;  %v1639_v41 = vpop.f32.mrb[9].mxu0  ;;  %v362_v24 = vld [vmem:[#allocation2 + $0xc0] sm:$0xff] }
  0xf8   : > { %v877_v39 = vadd.f32 %v1602_v60, %v838_v30  ;;  %v1308_v42 = vpack.c.bf16 %v910_v31, %v910_v31  ;;  %v1290_v43 = vpack.c.bf16 %v892_v32, %v892_v32  ;;  %v911_v44 = vmax.f32 %v879_v33, 0.0  ;;  %v788_v46 = vld [vmem:[#allocation2 + $0x30] sm:$0xff]  ;;  %v1641_v47 = vpop.f32.mrb[9].mxu1  ;;  %v1643_v48 = vpop.f32.mrb[10].mxu0  ;;  %v349_v30 = vld [vmem:[#allocation2 + $0x58] sm:$0xff] }
  0xf9   : > { %v893_v45 = vmax.f32 %v861_v34, 0.0  ;;  %1055 = vst.msk [vmem:[%s1630_s9 + $0x8] sm:$0xf] %vm1052_vm4, %v1292_v36  ;;  %v1306_v49 = vpack.c.bf16 %v908_v37, %v908_v37  ;;  %v1293_v51 = vpack.c.bf16 %v895_v38, %v895_v38  ;;  %v827_v53 = vmul.f32 %v1597_v50, %v788_v46  ;;  %v804_v54 = vld [vmem:[#allocation2 + $0xb0] sm:$0xff]  ;;  %v786_v55 = vld [vmem:[#allocation2 + $0x20] sm:$0xff]  ;;  %v1648_v56 = vpop.f32.mrb[10].mxu1 }
  0xfa   : > { %v909_v52 = vmax.f32 %v877_v39, 0.0  ;;  %v1650_v57 = vpop.f32.mrb[11].mxu0  ;;  %1071 = vst.msk [vmem:[%s1630_s9 + $0x48] sm:$0xf] %vm1052_vm4, %v1308_v42  ;;  %1053 = vst.msk [vmem:[%s1630_s9] sm:$0xf] %vm1052_vm4, %v1290_v43  ;;  %v1309_v58 = vpack.c.bf16 %v911_v44, %v911_v44  ;;  %v843_v61 = vmul.f32 %v1597_v50, %v804_v54  ;;  %v825_v62 = vmul.f32 %v1597_v50, %v786_v55 }
  0xfb   : > { %v1291_v59 = vpack.c.bf16 %v893_v45, %v893_v45  ;;  %v802_v63 = vld [vmem:[#allocation2 + $0xa0] sm:$0xff]  ;;  %v789_v0 = vld [vmem:[#allocation2 + $0x38] sm:$0xff]  ;;  %v1658_v1 = vpop.f32.mrb[11].mxu1  ;;  %1069 = vst.msk [vmem:[%s1630_s9 + $0x40] sm:$0xf] %vm1052_vm4, %v1306_v49  ;;  %v866_v3 = vadd.f32 %v1602_v60, %v827_v53  ;;  %v347_v39 = vld [vmem:[#allocation2 + $0x48] sm:$0xff] }
  0xfc   : > { %1056 = vst.msk [vmem:[%s1630_s9 + $0xc] sm:$0xf] %vm1052_vm4, %v1293_v51  ;;  %v1307_v2 = vpack.c.bf16 %v909_v52, %v909_v52  ;;  %v841_v4 = vmul.f32 %v1597_v50, %v802_v63  ;;  %v828_v5 = vmul.f32 %v1597_v50, %v789_v0  ;;  %v805_v6 = vld [vmem:[#allocation2 + $0xb8] sm:$0xff]  ;;  %v787_v7 = vld [vmem:[#allocation2 + $0x28] sm:$0xff]  ;;  %1072 = vst.msk [vmem:[%s1630_s9 + $0x4c] sm:$0xf] %vm1052_vm4, %v1309_v58 }
  0xfd   : > { %1054 = vst.msk [vmem:[%s1630_s9 + $0x4] sm:$0xf] %vm1052_vm4, %v1291_v59  ;;  %v882_v8 = vadd.f32 %v1602_v60, %v843_v61  ;;  %v864_v9 = vadd.f32 %v1602_v60, %v825_v62  ;;  %v844_v10 = vmul.f32 %v1597_v50, %v805_v6  ;;  %v826_v11 = vmul.f32 %v1597_v50, %v787_v7  ;;  %v803_v12 = vld [vmem:[#allocation2 + $0xa8] sm:$0xff]  ;;  %v365_v31 = vld [vmem:[#allocation2 + $0xd8] sm:$0xff]  ;;  %v352_v52 = vld [vmem:[#allocation2 + $0x70] sm:$0xff] }
  0xfe   : > { %1070 = vst.msk [vmem:[%s1630_s9 + $0x44] sm:$0xf] %vm1052_vm4, %v1307_v2  ;;  %v898_v13 = vmax.f32 %v866_v3, 0.0  ;;  %v880_v14 = vadd.f32 %v1602_v60, %v841_v4  ;;  %v867_v15 = vadd.f32 %v1602_v60, %v828_v5  ;;  %v842_v16 = vmul.f32 %v1597_v50, %v803_v12  ;;  %v1358_v25 = vpop.f32.mrb[12].mxu0  ;;  %v363_v42 = vld [vmem:[#allocation2 + $0xc8] sm:$0xff]  ;;  %v368_v53 = vld [vmem:[#allocation2 + $0xf0] sm:$0xff] }
  0xff   : > { %v914_v18 = vmax.f32 %v882_v8, 0.0  ;;  %v896_v19 = vmax.f32 %v864_v9, 0.0  ;;  %v883_v20 = vadd.f32 %v1602_v60, %v844_v10  ;;  %v865_v21 = vadd.f32 %v1602_v60, %v826_v11  ;;  %v1374_v32 = vpop.f32.mrb[12].mxu1  ;;  %v635_v33 = vpop.f32.mrb[13].mxu0  ;;  %v350_v54 = vld [vmem:[#allocation2 + $0x60] sm:$0xff]  ;;  %v353_v0 = vld [vmem:[#allocation2 + $0x78] sm:$0xff] }
 0x100   : > { %v1296_v26 = vpack.c.bf16 %v898_v13, %v898_v13  ;;  %v912_v27 = vmax.f32 %v880_v14, 0.0  ;;  %v899_v28 = vmax.f32 %v867_v15, 0.0  ;;  %v881_v29 = vadd.f32 %v1602_v60, %v842_v16  ;;  %v699_v43 = vpop.f32.mrb[13].mxu1  ;;  %v1359_v44 = vpop.f32.mrb[14].mxu0  ;;  %v369_v2 = vld [vmem:[#allocation2 + $0xf8] sm:$0xff]  ;;  %v351_v7 = vld [vmem:[#allocation2 + $0x68] sm:$0xff] }
 0x101   : > { %v1312_v34 = vpack.c.bf16 %v914_v18, %v914_v18  ;;  %v1294_v36 = vpack.c.bf16 %v896_v19, %v896_v19  ;;  %v915_v37 = vmax.f32 %v883_v20, 0.0  ;;  %v897_v38 = vmax.f32 %v865_v21, 0.0  ;;  %v1375_v55 = vpop.f32.mrb[14].mxu1  ;;  %v638_v58 = vpop.f32.mrb[15].mxu0 }
 0x102   : > { %1059 = vst.msk [vmem:[%s1630_s9 + $0x18] sm:$0xf] %vm1052_vm4, %v1296_v26  ;;  %v1310_v45 = vpack.c.bf16 %v912_v27, %v912_v27  ;;  %v1297_v46 = vpack.c.bf16 %v899_v28, %v899_v28  ;;  %v913_v49 = vmax.f32 %v881_v29, 0.0  ;;  %v724_v51 = vadd.f32 %v1634_v35, %v348_v17  ;;  %v366_v35 = vld [vmem:[#allocation2 + $0xe0] sm:$0xff]  ;;  %v702_v3 = vpop.f32.mrb[15].mxu1 }
 0x103   : > { %1075 = vst.msk [vmem:[%s1630_s9 + $0x58] sm:$0xf] %vm1052_vm4, %v1312_v34  ;;  %1057 = vst.msk [vmem:[%s1630_s9 + $0x10] sm:$0xf] %vm1052_vm4, %v1294_v36  ;;  %v1313_v59 = vpack.c.bf16 %v915_v37, %v915_v37  ;;  %v1295_v61 = vpack.c.bf16 %v897_v38, %v897_v38  ;;  %v740_v62 = vadd.f32 %v1637_v40, %v364_v22 }
 0x104   : > { %v722_v63 = vadd.f32 %v1639_v41, %v346_v23  ;;  %1073 = vst.msk [vmem:[%s1630_s9 + $0x50] sm:$0xf] %vm1052_vm4, %v1310_v45  ;;  %1060 = vst.msk [vmem:[%s1630_s9 + $0x1c] sm:$0xf] %vm1052_vm4, %v1297_v46  ;;  %v1311_v4 = vpack.c.bf16 %v913_v49, %v913_v49  ;;  %v738_v5 = vadd.f32 %v1641_v47, %v362_v24  ;;  %v367_v41 = vld [vmem:[#allocation2 + $0xe8] sm:$0xff] }
 0x105   : > { %757 = vst.msk [vmem:[#allocation2 + $0x50] sm:$0xff] %vm305_vm2, %v724_v51  ;;  %v725_v6 = vadd.f32 %v1643_v48, %v349_v30  ;;  %v741_v40 = vadd.f32 %v1648_v56, %v365_v31  ;;  %773 = vst.msk [vmem:[#allocation2 + $0xd0] sm:$0xff] %vm305_vm2, %v740_v62  ;;  %v723_v8 = vadd.f32 %v1650_v57, %v347_v39 }
 0x106   : > { %1076 = vst.msk [vmem:[%s1630_s9 + $0x5c] sm:$0xf] %vm1052_vm4, %v1313_v59  ;;  %1058 = vst.msk [vmem:[%s1630_s9 + $0x14] sm:$0xf] %vm1052_vm4, %v1295_v61  ;;  %v739_v9 = vadd.f32 %v1658_v1, %v363_v42  ;;  %v728_v10 = vadd.f32 %v1358_v25, %v352_v52  ;;  %v744_v47 = vadd.f32 %v1374_v32, %v368_v53 }
 0x107   : > { %755 = vst.msk [vmem:[#allocation2 + $0x40] sm:$0xff] %vm305_vm2, %v722_v63  ;;  %771 = vst.msk [vmem:[#allocation2 + $0xc0] sm:$0xff] %vm305_vm2, %v738_v5  ;;  %v726_v48 = vadd.f32 %v635_v33, %v350_v54  ;;  %v742_v56 = vadd.f32 %v699_v43, %v366_v35  ;;  %v729_v11 = vadd.f32 %v1359_v44, %v353_v0 }
 0x108   : > { %1074 = vst.msk [vmem:[%s1630_s9 + $0x54] sm:$0xf] %vm1052_vm4, %v1311_v4  ;;  %v745_v12 = vadd.f32 %v1375_v55, %v369_v2  ;;  %v727_v57 = vadd.f32 %v638_v58, %v351_v7  ;;  %v743_v1 = vadd.f32 %v702_v3, %v367_v41 }
 0x109   : > { %758 = vst.msk [vmem:[#allocation2 + $0x58] sm:$0xff] %vm305_vm2, %v725_v6  ;;  %774 = vst.msk [vmem:[#allocation2 + $0xd8] sm:$0xff] %vm305_vm2, %v741_v40 }
 0x10a   : > { %756 = vst.msk [vmem:[#allocation2 + $0x48] sm:$0xff] %vm305_vm2, %v723_v8  ;;  %772 = vst.msk [vmem:[#allocation2 + $0xc8] sm:$0xff] %vm305_vm2, %v739_v9 }
 0x10b   : > { %761 = vst.msk [vmem:[#allocation2 + $0x70] sm:$0xff] %vm305_vm2, %v728_v10  ;;  %777 = vst.msk [vmem:[#allocation2 + $0xf0] sm:$0xff] %vm305_vm2, %v744_v47 }
 0x10c   : > { %759 = vst.msk [vmem:[#allocation2 + $0x60] sm:$0xff] %vm305_vm2, %v726_v48  ;;  %775 = vst.msk [vmem:[#allocation2 + $0xe0] sm:$0xff] %vm305_vm2, %v742_v56  ;;  %v792_v13 = vld [vmem:[#allocation2 + $0x50] sm:$0xff] }
 0x10d   : > { %762 = vst.msk [vmem:[#allocation2 + $0x78] sm:$0xff] %vm305_vm2, %v729_v11  ;;  %778 = vst.msk [vmem:[#allocation2 + $0xf8] sm:$0xff] %vm305_vm2, %v745_v12  ;;  %v831_v14 = vmul.f32 %v1597_v50, %v792_v13  ;;  %v808_v15 = vld [vmem:[#allocation2 + $0xd0] sm:$0xff] }
 0x10e   : > { %760 = vst.msk [vmem:[#allocation2 + $0x68] sm:$0xff] %vm305_vm2, %v727_v57  ;;  %776 = vst.msk [vmem:[#allocation2 + $0xe8] sm:$0xff] %vm305_vm2, %v743_v1  ;;  %v790_v16 = vld [vmem:[#allocation2 + $0x40] sm:$0xff]  ;;  %v847_v17 = vmul.f32 %v1597_v50, %v808_v15 }
 0x10f   : > { %v829_v18 = vmul.f32 %v1597_v50, %v790_v16  ;;  %v806_v19 = vld [vmem:[#allocation2 + $0xc0] sm:$0xff]  ;;  %v870_v22 = vadd.f32 %v1602_v60, %v831_v14 }
 0x110   : > { %v793_v20 = vld [vmem:[#allocation2 + $0x58] sm:$0xff]  ;;  %v845_v23 = vmul.f32 %v1597_v50, %v806_v19  ;;  %v886_v28 = vadd.f32 %v1602_v60, %v847_v17 }
 0x111   : > { %v809_v21 = vld [vmem:[#allocation2 + $0xd8] sm:$0xff]  ;;  %v832_v24 = vmul.f32 %v1597_v50, %v793_v20  ;;  %v791_v26 = vld [vmem:[#allocation2 + $0x48] sm:$0xff]  ;;  %v868_v29 = vadd.f32 %v1602_v60, %v829_v18  ;;  %v902_v32 = vmax.f32 %v870_v22, 0.0 }
 0x112   : > { %v848_v25 = vmul.f32 %v1597_v50, %v809_v21  ;;  %v807_v27 = vld [vmem:[#allocation2 + $0xc8] sm:$0xff]  ;;  %v830_v30 = vmul.f32 %v1597_v50, %v791_v26  ;;  %v884_v33 = vadd.f32 %v1602_v60, %v845_v23  ;;  %v918_v37 = vmax.f32 %v886_v28, 0.0  ;;  %v796_v43 = vld [vmem:[#allocation2 + $0x70] sm:$0xff] }
 0x113   : > { %v846_v31 = vmul.f32 %v1597_v50, %v807_v27  ;;  %v871_v34 = vadd.f32 %v1602_v60, %v832_v24  ;;  %v900_v38 = vmax.f32 %v868_v29, 0.0  ;;  %v1300_v44 = vpack.c.bf16 %v902_v32, %v902_v32  ;;  %v812_v51 = vld [vmem:[#allocation2 + $0xf0] sm:$0xff]  ;;  %v794_v52 = vld [vmem:[#allocation2 + $0x60] sm:$0xff] }
 0x114   : > { %v887_v36 = vadd.f32 %v1602_v60, %v848_v25  ;;  %v869_v39 = vadd.f32 %v1602_v60, %v830_v30  ;;  %v916_v45 = vmax.f32 %v884_v33, 0.0  ;;  %v1316_v53 = vpack.c.bf16 %v918_v37, %v918_v37  ;;  %v810_v59 = vld [vmem:[#allocation2 + $0xe0] sm:$0xff]  ;;  %v797_v61 = vld [vmem:[#allocation2 + $0x78] sm:$0xff] }
 0x115   : > { %v885_v42 = vadd.f32 %v1602_v60, %v846_v31  ;;  %v903_v46 = vmax.f32 %v871_v34, 0.0  ;;  %v1298_v54 = vpack.c.bf16 %v900_v38, %v900_v38  ;;  %v813_v62 = vld [vmem:[#allocation2 + $0xf8] sm:$0xff]  ;;  %1063 = vst.msk [vmem:[%s1630_s9 + $0x28] sm:$0xf] %vm1052_vm4, %v1300_v44  ;;  %v835_v2 = vmul.f32 %v1597_v50, %v796_v43  ;;  %v795_v3 = vld [vmem:[#allocation2 + $0x68] sm:$0xff] }
 0x116   : > { %v919_v49 = vmax.f32 %v887_v36, 0.0  ;;  %v901_v55 = vmax.f32 %v869_v39, 0.0  ;;  %v1314_v63 = vpack.c.bf16 %v916_v45, %v916_v45  ;;  %v811_v4 = vld [vmem:[#allocation2 + $0xe8] sm:$0xff]  ;;  %1079 = vst.msk [vmem:[%s1630_s9 + $0x68] sm:$0xf] %vm1052_vm4, %v1316_v53  ;;  %v851_v40 = vmul.f32 %v1597_v50, %v812_v51 }
 0x117   : > { %v917_v58 = vmax.f32 %v885_v42, 0.0  ;;  %v1301_v35 = vpack.c.bf16 %v903_v46, %v903_v46  ;;  %1061 = vst.msk [vmem:[%s1630_s9 + $0x20] sm:$0xf] %vm1052_vm4, %v1298_v54  ;;  %v833_v7 = vmul.f32 %v1597_v50, %v794_v52  ;;  %v874_v41 = vadd.f32 %v1602_v60, %v835_v2 }
 0x118   : > { %v1317_v0 = vpack.c.bf16 %v919_v49, %v919_v49  ;;  %v1299_v5 = vpack.c.bf16 %v901_v55, %v901_v55  ;;  %1077 = vst.msk [vmem:[%s1630_s9 + $0x60] sm:$0xf] %vm1052_vm4, %v1314_v63  ;;  %v849_v8 = vmul.f32 %v1597_v50, %v810_v59  ;;  %v836_v9 = vmul.f32 %v1597_v50, %v797_v61 }
 0x119   : > { %v1315_v6 = vpack.c.bf16 %v917_v58, %v917_v58  ;;  %1064 = vst.msk [vmem:[%s1630_s9 + $0x2c] sm:$0xf] %vm1052_vm4, %v1301_v35  ;;  %v852_v10 = vmul.f32 %v1597_v50, %v813_v62  ;;  %v890_v47 = vadd.f32 %v1602_v60, %v851_v40  ;;  %v872_v48 = vadd.f32 %v1602_v60, %v833_v7 }
 0x11a   : > { %1080 = vst.msk [vmem:[%s1630_s9 + $0x6c] sm:$0xf] %vm1052_vm4, %v1317_v0  ;;  %1062 = vst.msk [vmem:[%s1630_s9 + $0x24] sm:$0xf] %vm1052_vm4, %v1299_v5  ;;  %v834_v56 = vmul.f32 %v1597_v50, %v795_v3  ;;  %v850_v11 = vmul.f32 %v1597_v50, %v811_v4  ;;  %v906_v12 = vmax.f32 %v874_v41, 0.0  ;;  %v888_v57 = vadd.f32 %v1602_v60, %v849_v8 }
 0x11b   : > { %1078 = vst.msk [vmem:[%s1630_s9 + $0x64] sm:$0xf] %vm1052_vm4, %v1315_v6  ;;  %v875_v1 = vadd.f32 %v1602_v60, %v836_v9  ;;  %v891_v13 = vadd.f32 %v1602_v60, %v852_v10  ;;  %v922_v14 = vmax.f32 %v890_v47, 0.0  ;;  %v904_v15 = vmax.f32 %v872_v48, 0.0 }
 0x11c   : > { %v873_v16 = vadd.f32 %v1602_v60, %v834_v56  ;;  %v889_v17 = vadd.f32 %v1602_v60, %v850_v11  ;;  %v1304_v18 = vpack.c.bf16 %v906_v12, %v906_v12  ;;  %v920_v19 = vmax.f32 %v888_v57, 0.0 }
 0x11d   : > { %v907_v50 = vmax.f32 %v875_v1, 0.0  ;;  %v923_v20 = vmax.f32 %v891_v13, 0.0  ;;  %v1320_v21 = vpack.c.bf16 %v922_v14, %v922_v14  ;;  %v1302_v22 = vpack.c.bf16 %v904_v15, %v904_v15 }
 0x11e   : > { %v905_v23 = vmax.f32 %v873_v16, 0.0  ;;  %v921_v24 = vmax.f32 %v889_v17, 0.0  ;;  %1067 = vst.msk [vmem:[%s1630_s9 + $0x38] sm:$0xf] %vm1052_vm4, %v1304_v18  ;;  %v1318_v25 = vpack.c.bf16 %v920_v19, %v920_v19 }
 0x11f   : > { %v1305_v26 = vpack.c.bf16 %v907_v50, %v907_v50  ;;  %v1321_v27 = vpack.c.bf16 %v923_v20, %v923_v20  ;;  %1083 = vst.msk [vmem:[%s1630_s9 + $0x78] sm:$0xf] %vm1052_vm4, %v1320_v21  ;;  %1065 = vst.msk [vmem:[%s1630_s9 + $0x30] sm:$0xf] %vm1052_vm4, %v1302_v22 }
 0x120   : > { %v1303_v60 = vpack.c.bf16 %v905_v23, %v905_v23  ;;  %v1319_v28 = vpack.c.bf16 %v921_v24, %v921_v24  ;;  %1081 = vst.msk [vmem:[%s1630_s9 + $0x70] sm:$0xf] %vm1052_vm4, %v1318_v25 }
 0x121   : > { %1068 = vst.msk [vmem:[%s1630_s9 + $0x3c] sm:$0xf] %vm1052_vm4, %v1305_v26  ;;  %1084 = vst.msk [vmem:[%s1630_s9 + $0x7c] sm:$0xf] %vm1052_vm4, %v1321_v27 }
 0x122   : > { %1066 = vst.msk [vmem:[%s1630_s9 + $0x34] sm:$0xf] %vm1052_vm4, %v1303_v60  ;;  %1082 = vst.msk [vmem:[%s1630_s9 + $0x74] sm:$0xf] %vm1052_vm4, %v1319_v28 }
 0x123 PF: > { %s14_s17 = sadd.s32 1, %s1446_s17   ;;  %s1802_s15 = smov %s1442_s16 }
 0x124   : > { %p11_p5 = scmp.ge.s32.totalorder %s14_s17, 10   ;;  %s1803_s16 = smov %s1805_s18 }
 0x126   :  { %13 = sbr.rel (!%p11_p5) target bundleno = 2 (0x2), region = 83 }

</bundles_post_ra>
